<compile_context>
chip_gen: v7x
topology: tpu7x:2x2x1
jax: 0.10.0
libtpu: 0.0.40
codegen_flags: <defaults>
</compile_context>

<pallas_src>
import functools

import jax
import jax.numpy as jnp
from jax.experimental import pallas as pl
from jax.experimental.pallas import tpu as pltpu


def _sigmoid(x):
    # Numerically stable logistic; tanh lowers to the EUP (its own VLIW slot).
    return 0.5 * (jnp.tanh(0.5 * x) + 1.0)


def _round_up(x, m):
    return ((x + m - 1) // m) * m


def _num_tensorcores():
    """2 on v7x (two TCs/chip), else 1.  Best-effort; falls back to 1."""
    try:
        kind = jax.devices()[0].device_kind.lower()
        if "v7" in kind:
            return 2
    except Exception:
        pass
    return 1


def mlpx1sv_kernel(dims, s_ref, v_ref,
                   w1_ref, w2_ref, w3v_ref, w3p_ref, w4_ref,
                   b_ref,  # packed biases: (max_dout, 4) f32, one column per layer
                   o_ref):
    d1, d2, d3, d4 = dims

    w1 = w1_ref[...]
    w2 = w2_ref[...]
    w3v = w3v_ref[...]
    w3p = w3p_ref[...]
    w4 = w4_ref[...]
    mm = w1.dtype  # matmul operand dtype (f32 or bf16); accumulation is always f32.

    # Activations: (features, batch) -> batch on the 128-lane axis.
    s = s_ref[...].astype(mm)
    v = v_ref[...].astype(mm)

    # Static slices of the packed-bias slab (zero runtime cost); each is (d, 1)
    # and broadcasts along the lane (batch) axis.
    b1 = b_ref[0:d1, 0:1]
    b2 = b_ref[0:d2, 1:2]
    b3 = b_ref[0:d3, 2:3]
    b4 = b_ref[0:d4, 3:4]

    # f_s2parav: Linear -> Sigmoid -> Linear -> Sigmoid
    h1 = _sigmoid(jnp.dot(w1, s, preferred_element_type=jnp.float32) + b1)
    parav = _sigmoid(jnp.dot(w2, h1.astype(mm), preferred_element_type=jnp.float32) + b2)

    # f_vparav2x on cat([v, parav]) realized as two matmuls over the split weight
    # (exactly equivalent; avoids a non-8-aligned sublane concat).
    h2 = _sigmoid(jnp.dot(w3v, v, preferred_element_type=jnp.float32)
                  + jnp.dot(w3p, parav.astype(mm), preferred_element_type=jnp.float32)
                  + b3)
    x = _sigmoid(jnp.dot(w4, h2.astype(mm), preferred_element_type=jnp.float32) + b4)

    o_ref[...] = x.astype(o_ref.dtype)


def init_params(key, dim_s, dims_pres2parav, dim_v, dims_prev2postx, dim_x):
    """Deterministic synthetic parameters, PyTorch convention: weights (in, out)."""
    dims_a = [dim_s] + dims_pres2parav                                   # f_s2parav
    dims_b = [dim_v + dims_pres2parav[-1]] + dims_prev2postx + [dim_x]   # f_vparav2x
    params = []
    for din, dout in list(zip(dims_a[:-1], dims_a[1:])) + list(zip(dims_b[:-1], dims_b[1:])):
        key, kw, kb = jax.random.split(key, 3)
        bound = 1.0 / jnp.sqrt(din)
        w = jax.random.uniform(kw, (din, dout), jnp.float32, -bound, bound)
        b = jax.random.uniform(kb, (dout,), jnp.float32, -bound, bound)
        params.append((w, b))
    return params  # [(w1,b1),(w2,b2),(w3,b3),(w4,b4)]


def pack_params(params, dim_v, matmul_dtype=jnp.float32):
    """One-time prep: transpose weights to (out, in), split w3 over [v, parav],
    pack biases into one (max_dout, 4) slab.  matmul_dtype=bf16 halves MXU passes
    and weight bytes on v6e/v7x (accumulation stays f32)."""
    (w1, b1), (w2, b2), (w3, b3), (w4, b4) = params
    w1t = jnp.asarray(w1.T, matmul_dtype)
    w2t = jnp.asarray(w2.T, matmul_dtype)
    w3t = jnp.asarray(w3.T, matmul_dtype)       # (d3, dim_v + dim_parav)
    w3vt = w3t[:, :dim_v]
    w3pt = w3t[:, dim_v:]
    w4t = jnp.asarray(w4.T, matmul_dtype)
    dims = (int(w1t.shape[0]), int(w2t.shape[0]), int(w3t.shape[0]), int(w4t.shape[0]))
    max_d = max(dims)
    pad = lambda b: jnp.pad(b, (0, max_d - b.shape[0]))
    b_packed = jnp.stack([pad(b1), pad(b2), pad(b3), pad(b4)], axis=1).astype(jnp.float32)
    return (w1t, w2t, w3vt, w3pt, w4t, b_packed, dims)


def _choose_batch_tile(B, batch_tile):
    """Return None for the gridless path, else a lane-aligned batch tile."""
    if batch_tile is None:
        return None
    batch_tile = _round_up(int(batch_tile), 128)
    n_cores = _num_tensorcores()
    if n_cores >= 2 and B >= n_cores * 128:
        # Force >= n_cores tiles so the "parallel" batch axis spans both TCs (v7x).
        return min(batch_tile, max(128, _round_up(pl.cdiv(B, n_cores), 128)))
    if B > batch_tile:
        return batch_tile
    return None


def mlpx1sv_forward_t(s_t, v_t, packed, *, batch_tile=8192, out_dtype=None):
    """Fast entry point: lane-dense layout. s_t: (dim_s, B), v_t: (dim_v, B).
    Returns x_t: (dim_x, B)."""
    w1t, w2t, w3vt, w3pt, w4t, b_packed, dims = packed
    dim_s, B = s_t.shape
    dim_v = v_t.shape[0]
    dim_x = int(w4t.shape[0])
    out_dtype = s_t.dtype if out_dtype is None else out_dtype

    kernel = functools.partial(mlpx1sv_kernel, dims)
    weight_inputs = (w1t, w2t, w3vt, w3pt, w4t, b_packed)

    tb = _choose_batch_tile(B, batch_tile)
    if tb is None:
        # --- Gridless path: no pipeline machinery, all operands whole in VMEM. ---
        in_specs = [pl.BlockSpec(memory_space=pltpu.MemorySpace.VMEM)] * (2 + len(weight_inputs))
        return pl.pallas_call(
            kernel,
            out_shape=jax.ShapeDtypeStruct((dim_x, B), out_dtype),
            in_specs=in_specs,
            out_specs=pl.BlockSpec(memory_space=pltpu.MemorySpace.VMEM),
        )(s_t, v_t, *weight_inputs)

    # --- Batch-tiled path: grid over batch only (lane axis); weights VMEM-resident
    #     via constant index_maps; ragged last tile handled by Pallas edge blocks
    #     (no wrapper pad / no extra HBM copy of the inputs). ---
    n_tiles = pl.cdiv(B, tb)
    in_specs = [
        pl.BlockSpec((dim_s, tb), lambda i: (0, i)),
        pl.BlockSpec((dim_v, tb), lambda i: (0, i)),
    ] + [pl.BlockSpec(w.shape, lambda i: (0, 0)) for w in weight_inputs]
    out_specs = pl.BlockSpec((dim_x, tb), lambda i: (0, i))

    return pl.pallas_call(
        kernel,
        out_shape=jax.ShapeDtypeStruct((dim_x, B), out_dtype),
        grid=(n_tiles,),
        in_specs=in_specs,
        out_specs=out_specs,
        compiler_params=pltpu.CompilerParams(
            dimension_semantics=("parallel",)),   # lets v7x shard batch across its 2 TCs
    )(s_t, v_t, *weight_inputs)


def mlpx1sv_forward(s, v, packed, **kw):
    """PyTorch-layout convenience wrapper: s (B, dim_s), v (B, dim_v) -> (B, dim_x).
    Pays one HBM transpose each way; performance-sensitive callers should supply
    the (features, batch) layout directly via mlpx1sv_forward_t."""
    return mlpx1sv_forward_t(s.T, v.T, packed, **kw).T


def mlpx1sv_reference(s, v, params):
    (w1, b1), (w2, b2), (w3, b3), (w4, b4) = params
    h1 = jax.nn.sigmoid(s @ w1 + b1)
    parav = jax.nn.sigmoid(h1 @ w2 + b2)
    cat = jnp.concatenate([v, parav], axis=-1)
    h2 = jax.nn.sigmoid(cat @ w3 + b3)
    return jax.nn.sigmoid(h2 @ w4 + b4)


if __name__ == "__main__":
    # Small config implied by the module's __init__:
    B = 2
    dim_s = 8
    dims_pres2parav = [16, 12]   # last entry = dim_parav
    dim_v = 6
    dims_prev2postx = [24]
    dim_x = 10

    key = jax.random.PRNGKey(0)
    kp, ks, kv = jax.random.split(key, 3)

    params = init_params(kp, dim_s, dims_pres2parav, dim_v, dims_prev2postx, dim_x)
    packed = pack_params(params, dim_v)

    # 1) Small batch, PyTorch (batch, feature) layout -> gridless path.
    s = jax.random.normal(ks, (B, dim_s), jnp.float32)
    v = jax.random.normal(kv, (B, dim_v), jnp.float32)
    out = jax.block_until_ready(mlpx1sv_forward(s, v, packed))
    ref = mlpx1sv_reference(s, v, params)
    assert out.shape == (B, dim_x)
    assert jnp.allclose(out, ref, atol=1e-5, rtol=1e-5)

    # 2) Lane-dense (feature, batch) layout, batch-tiled path with a ragged last
    #    tile (300 = 2*128 + 44), no wrapper padding.
    B2 = 300
    s2t = jax.random.normal(jax.random.PRNGKey(1), (dim_s, B2), jnp.float32)
    v2t = jax.random.normal(jax.random.PRNGKey(2), (dim_v, B2), jnp.float32)
    out2t = jax.block_until_ready(mlpx1sv_forward_t(s2t, v2t, packed, batch_tile=128))
    ref2 = mlpx1sv_reference(s2t.T, v2t.T, params)
    assert out2t.shape == (dim_x, B2)
    assert jnp.allclose(out2t.T, ref2, atol=1e-5, rtol=1e-5)

    # 3) bf16 MXU operands (v6e/v7x-friendly), f32 accumulation + elementwise.
    packed_bf16 = pack_params(params, dim_v, matmul_dtype=jnp.bfloat16)
    out3t = jax.block_until_ready(mlpx1sv_forward_t(s2t, v2t, packed_bf16, batch_tile=128))
    assert out3t.shape == (dim_x, B2)
    assert jnp.allclose(out3t.T, ref2, atol=5e-2, rtol=0)

    print("KERNEL_OK")
</pallas_src>

<mosaic_0001>
module attributes {stable_mosaic.version = 11 : i64} {
  func.func @mlpx1sv_kernel(%arg0: memref<8x2xf32, #tpu.memory_space<vmem>>, %arg1: memref<6x2xf32, #tpu.memory_space<vmem>>, %arg2: memref<16x8xf32, #tpu.memory_space<vmem>>, %arg3: memref<12x16xf32, #tpu.memory_space<vmem>>, %arg4: memref<24x6xf32, #tpu.memory_space<vmem>>, %arg5: memref<24x12xf32, #tpu.memory_space<vmem>>, %arg6: memref<10x24xf32, #tpu.memory_space<vmem>>, %arg7: memref<24x4xf32, #tpu.memory_space<vmem>>, %arg8: memref<10x2xf32, #tpu.memory_space<vmem>>) attributes {dimension_semantics = [], scalar_prefetch = 0 : i64, scratch_operands = 0 : i64, tpu.core_type = #tpu.core_type<tc>} {
    %c0 = arith.constant 0 : index
    %c0_0 = arith.constant 0 : index
    %0 = vector.load %arg2[%c0, %c0_0] : memref<16x8xf32, #tpu.memory_space<vmem>>, vector<16x8xf32>
    %c0_1 = arith.constant 0 : index
    %c0_2 = arith.constant 0 : index
    %1 = vector.load %arg3[%c0_1, %c0_2] : memref<12x16xf32, #tpu.memory_space<vmem>>, vector<12x16xf32>
    %c0_3 = arith.constant 0 : index
    %c0_4 = arith.constant 0 : index
    %2 = vector.load %arg4[%c0_3, %c0_4] : memref<24x6xf32, #tpu.memory_space<vmem>>, vector<24x6xf32>
    %c0_5 = arith.constant 0 : index
    %c0_6 = arith.constant 0 : index
    %3 = vector.load %arg5[%c0_5, %c0_6] : memref<24x12xf32, #tpu.memory_space<vmem>>, vector<24x12xf32>
    %c0_7 = arith.constant 0 : index
    %c0_8 = arith.constant 0 : index
    %4 = vector.load %arg6[%c0_7, %c0_8] : memref<10x24xf32, #tpu.memory_space<vmem>>, vector<10x24xf32>
    %c0_9 = arith.constant 0 : index
    %c0_10 = arith.constant 0 : index
    %5 = vector.load %arg0[%c0_9, %c0_10] : memref<8x2xf32, #tpu.memory_space<vmem>>, vector<8x2xf32>
    %c0_11 = arith.constant 0 : index
    %c0_12 = arith.constant 0 : index
    %6 = vector.load %arg1[%c0_11, %c0_12] : memref<6x2xf32, #tpu.memory_space<vmem>>, vector<6x2xf32>
    %c0_13 = arith.constant 0 : index
    %c0_14 = arith.constant 0 : index
    %7 = vector.load %arg7[%c0_13, %c0_14] : memref<24x4xf32, #tpu.memory_space<vmem>>, vector<16x1xf32>
    %c0_15 = arith.constant 0 : index
    %c1 = arith.constant 1 : index
    %8 = vector.load %arg7[%c0_15, %c1] : memref<24x4xf32, #tpu.memory_space<vmem>>, vector<12x1xf32>
    %c0_16 = arith.constant 0 : index
    %c2 = arith.constant 2 : index
    %9 = vector.load %arg7[%c0_16, %c2] : memref<24x4xf32, #tpu.memory_space<vmem>>, vector<24x1xf32>
    %c0_17 = arith.constant 0 : index
    %c3 = arith.constant 3 : index
    %10 = vector.load %arg7[%c0_17, %c3] : memref<24x4xf32, #tpu.memory_space<vmem>>, vector<10x1xf32>
    %cst = arith.constant dense<0.000000e+00> : vector<16x2xf32>
    %11 = tpu.matmul %0, %5, %cst {dimension_numbers = #tpu.dot_dimension_numbers<[1], [0], [0], [1], [0, 0, 1, 1], [], []>} : vector<16x8xf32>, vector<8x2xf32>, vector<16x2xf32> -> vector<16x2xf32>
    %12 = vector.broadcast %7 : vector<16x1xf32> to vector<16x2xf32>
    %13 = arith.addf %11, %12 : vector<16x2xf32>
    %cst_18 = arith.constant 5.000000e-01 : f32
    %14 = vector.broadcast %cst_18 : f32 to vector<16x2xf32>
    %15 = arith.mulf %14, %13 : vector<16x2xf32>
    %16 = math.tanh %15 : vector<16x2xf32>
    %cst_19 = arith.constant 1.000000e+00 : f32
    %17 = vector.broadcast %cst_19 : f32 to vector<16x2xf32>
    %18 = arith.addf %16, %17 : vector<16x2xf32>
    %cst_20 = arith.constant 5.000000e-01 : f32
    %19 = vector.broadcast %cst_20 : f32 to vector<16x2xf32>
    %20 = arith.mulf %19, %18 : vector<16x2xf32>
    %cst_21 = arith.constant dense<0.000000e+00> : vector<12x2xf32>
    %21 = tpu.matmul %1, %20, %cst_21 {dimension_numbers = #tpu.dot_dimension_numbers<[1], [0], [0], [1], [0, 0, 1, 1], [], []>} : vector<12x16xf32>, vector<16x2xf32>, vector<12x2xf32> -> vector<12x2xf32>
    %22 = vector.broadcast %8 : vector<12x1xf32> to vector<12x2xf32>
    %23 = arith.addf %21, %22 : vector<12x2xf32>
    %cst_22 = arith.constant 5.000000e-01 : f32
    %24 = vector.broadcast %cst_22 : f32 to vector<12x2xf32>
    %25 = arith.mulf %24, %23 : vector<12x2xf32>
    %26 = math.tanh %25 : vector<12x2xf32>
    %cst_23 = arith.constant 1.000000e+00 : f32
    %27 = vector.broadcast %cst_23 : f32 to vector<12x2xf32>
    %28 = arith.addf %26, %27 : vector<12x2xf32>
    %cst_24 = arith.constant 5.000000e-01 : f32
    %29 = vector.broadcast %cst_24 : f32 to vector<12x2xf32>
    %30 = arith.mulf %29, %28 : vector<12x2xf32>
    %cst_25 = arith.constant dense<0.000000e+00> : vector<24x2xf32>
    %31 = tpu.matmul %2, %6, %cst_25 {dimension_numbers = #tpu.dot_dimension_numbers<[1], [0], [0], [1], [0, 0, 1, 1], [], []>} : vector<24x6xf32>, vector<6x2xf32>, vector<24x2xf32> -> vector<24x2xf32>
    %cst_26 = arith.constant dense<0.000000e+00> : vector<24x2xf32>
    %32 = tpu.matmul %3, %30, %cst_26 {dimension_numbers = #tpu.dot_dimension_numbers<[1], [0], [0], [1], [0, 0, 1, 1], [], []>} : vector<24x12xf32>, vector<12x2xf32>, vector<24x2xf32> -> vector<24x2xf32>
    %33 = arith.addf %31, %32 : vector<24x2xf32>
    %34 = vector.broadcast %9 : vector<24x1xf32> to vector<24x2xf32>
    %35 = arith.addf %33, %34 : vector<24x2xf32>
    %cst_27 = arith.constant 5.000000e-01 : f32
    %36 = vector.broadcast %cst_27 : f32 to vector<24x2xf32>
    %37 = arith.mulf %36, %35 : vector<24x2xf32>
    %38 = math.tanh %37 : vector<24x2xf32>
    %cst_28 = arith.constant 1.000000e+00 : f32
    %39 = vector.broadcast %cst_28 : f32 to vector<24x2xf32>
    %40 = arith.addf %38, %39 : vector<24x2xf32>
    %cst_29 = arith.constant 5.000000e-01 : f32
    %41 = vector.broadcast %cst_29 : f32 to vector<24x2xf32>
    %42 = arith.mulf %41, %40 : vector<24x2xf32>
    %cst_30 = arith.constant dense<0.000000e+00> : vector<10x2xf32>
    %43 = tpu.matmul %4, %42, %cst_30 {dimension_numbers = #tpu.dot_dimension_numbers<[1], [0], [0], [1], [0, 0, 1, 1], [], []>} : vector<10x24xf32>, vector<24x2xf32>, vector<10x2xf32> -> vector<10x2xf32>
    %44 = vector.broadcast %10 : vector<10x1xf32> to vector<10x2xf32>
    %45 = arith.addf %43, %44 : vector<10x2xf32>
    %cst_31 = arith.constant 5.000000e-01 : f32
    %46 = vector.broadcast %cst_31 : f32 to vector<10x2xf32>
    %47 = arith.mulf %46, %45 : vector<10x2xf32>
    %48 = math.tanh %47 : vector<10x2xf32>
    %cst_32 = arith.constant 1.000000e+00 : f32
    %49 = vector.broadcast %cst_32 : f32 to vector<10x2xf32>
    %50 = arith.addf %48, %49 : vector<10x2xf32>
    %cst_33 = arith.constant 5.000000e-01 : f32
    %51 = vector.broadcast %cst_33 : f32 to vector<10x2xf32>
    %52 = arith.mulf %51, %50 : vector<10x2xf32>
    %c0_34 = arith.constant 0 : index
    %c0_35 = arith.constant 0 : index
    %53 = vector.load %arg8[%c0_34, %c0_35] : memref<10x2xf32, #tpu.memory_space<vmem>>, vector<10x2xf32>
    tpu.vector_store %arg8[%c0_34, %c0_35], %52 {strides = array<i32>} : memref<10x2xf32, #tpu.memory_space<vmem>>, vector<10x2xf32>,
    return
  }
}

</mosaic_0001>

<bundles_post_ra>
// kernel: tpu_custom_call.1
= control target key start
LH: loop header
LB: loop body
LE: loop exit
PB: predicated region body
PF: predicated region fallthrough
CT: control target
= control target key end

     0   :  { %vm58_vm0 = vcmask 64512   ;;  %v694_v3 = vmov 0   ;;  %vm157_vm1 = vcmask 130048   ;;  %v695_v7 = vmov 1   ;;  %s826_s0 = inlined_call_operand.vmem [shape: f32[8,2], index: 0, kind: input, shape index: {}]   ;;  %s827_s2 = inlined_call_operand.vmem [shape: f32[16,8], index: 2, kind: input, shape index: {}]   ;;  %s828_s7 = inlined_call_operand.vmem [shape: f32[24,4], index: 7, kind: input, shape index: {}]   ;;  %s829_s3 = inlined_call_operand.vmem [shape: f32[12,16], index: 3, kind: input, shape index: {}]   ;;  %s830_s1 = inlined_call_operand.vmem [shape: f32[6,2], index: 1, kind: input, shape index: {}]   ;;  %s831_s4 = inlined_call_operand.vmem [shape: f32[24,6], index: 4, kind: input, shape index: {}]   ;;  %s832_s5 = inlined_call_operand.vmem [shape: f32[24,12], index: 5, kind: input, shape index: {}]   ;;  %s833_s6 = inlined_call_operand.vmem [shape: f32[10,24], index: 6, kind: input, shape index: {}]   ;;  %s834_s8 = inlined_call_operand.vmem [shape: f32[10,2], index: 8, kind: output, shape index: {}]  }
   0x1   :  { %v41_v0 = vld [vmem:[%s826_s0] sm:$0xff]  ;;  %v30_v2 = vld [vmem:[%s827_s2 + $0x8] sm:$0xff]  ;;  %670 = vset.pattern.permute.xlu0 %v694_v3  ;;  %671 = vset.pattern.permute.xlu1 %v695_v7  ;;  %v696_v25 = vmov 0.0|0.0   ;;  %v697_v26 = vmov 0.0   ;;  %vm351_vm2 = vcmask 1045504   ;;  %vm341_vm3 = vcmask 48128  }
   0x2   :  { %v29_v1 = vld [vmem:[%s827_s2] sm:$0xff]  ;;  %605 = vmatprep.subr.mxu0 %v41_v0  ;;  %v44_v5 = vld [vmem:[%s828_s7 + $0x8] sm:$0xff]  ;;  %vm698_vm4 = vmmov 0   ;;  %v35_v30 = vld [vmem:[%s831_s4 + $0x10] sm:$0xff]  ;;  %v699_v31 = vmov 2   ;;  %vm257_vm5 = vcmask 1043456  }
   0x3   :  { %607 = vmatprep.mubr.msk.f32.mxu0 %vm58_vm0, %v29_v1  ;;  %v759_v4 = vld [vmem:[%s828_s7] sm:$0xff]  ;;  %606 = vmatpush3.msra.mxu0 %v41_v0  ;;  %v45_v8 = vld [vmem:[%s828_s7 + $0x8] sm:$0xf]  ;;  %v46_v32 = vld [vmem:[%s828_s7 + $0x10] sm:$0xff]  ;;  %vm700_vm6 = vmmov 1   ;;  %vm247_vm8 = vcmask 97280  }
   0x4   :  { %50 = vperm.xlu0 %670, %v759_v4   ;;  %608 = vmatmul.mubr.msk.f32.vlgmr.msra.gmra.mrb[0].mxu0 %vm58_vm0, %v30_v2  ;;  %v31_v6 = vld [vmem:[%s829_s3] sm:$0xff]  ;;  %v32_v24 = vld [vmem:[%s829_s3 + $0x8] sm:$0xf]  ;;  %vm656_vm7 = vmpackc.low %vm257_vm5, %vm700_vm6  ;;  %vm472_vm9 = vcmask 195584   ;;  %v701_v59 = vmov 3   ;;  %vm564_vm10 = vcmask 9216  }
   0x5   :  { %614 = vmatprep.mubr.msk.f32.mxu1 %vm157_vm1, %v31_v6  ;;  %149 = vperm.xlu1 %671, %v759_v4   ;;  %v42_v27 = vld [vmem:[%s830_s1] sm:$0x3f]  ;;  %v34_v29 = vld [vmem:[%s831_s4 + $0x8] sm:$0xff]  ;;  %v38_v50 = vld [vmem:[%s832_s5 + $0x10] sm:$0xff]  ;;  %vm562_vm11 = vcmask 15360  }
   0x6   :  { %654 = vmatprep.subr.bf16.mxu0 %v696_v25  ;;  %v33_v28 = vld [vmem:[%s831_s4] sm:$0xff]  ;;  %621 = vmatprep.mubr.msk.f32.mxu0 %vm698_vm4, %v697_v26  ;;  %v37_v49 = vld [vmem:[%s832_s5 + $0x8] sm:$0xff] }
   0x7   :  { %v36_v48 = vld [vmem:[%s832_s5] sm:$0xff]  ;;  %v47_v58 = vld [vmem:[%s828_s7 + $0x8] sm:$0x3] }
   0x8   :  { %55 = vperm.xlu0 %670, %v44_v5   ;;  %v39_v57 = vld [vmem:[%s833_s6] sm:$0xff] }
   0x9   :  { %154 = vperm.xlu1 %671, %v45_v8  }
   0xc   :  { %672 = vset.pattern.permute.xlu0 %v699_v31 }
   0xd   :  { %673 = vset.pattern.permute.xlu1 %v699_v31  ;;  %436 = vperm.xlu0 %672, %v759_v4  }
   0xe   :  { %440 = vperm.xlu1 %673, %v44_v5  }
  0x11   :  { %674 = vset.pattern.permute.xlu0 %v701_v59 }
  0x12   :  { %445 = vperm.xlu1 %673, %v46_v32   ;;  %464 = vperm.xlu0 %674, %v759_v4  }
  0x16   :  { %675 = vset.pattern.permute.xlu1 %v701_v59 }
  0x17   :  { %469 = vperm.xlu1 %675, %v47_v58  }
  0x83   :  { %v51_v9 = vpop.permute.xlu0 %50 }
  0x84   :  { %v150_v33 = vpop.permute.xlu1 %149 }
  0x87   :  { %v56_v10 = vpop.permute.xlu0 %55 }
  0x88   :  { %v155_v34 = vpop.permute.xlu1 %154 }
  0x8c   :  { %v437_v61 = vpop.permute.xlu0 %436 }
  0x8d   :  { %v441_v1 = vpop.permute.xlu1 %440 }
  0xd7   :  { %v609_v11 = vpop.f32.mrb[0].mxu0 }
  0xd8   :  { %v137_v12 = vadd.f32 %v609_v11, %v56_v10  ;;  %v131_v13 = vpop.f32.mrb[1].mxu0 }
  0xd9   :  { %v132_v14 = vadd.f32 %v131_v13, %v51_v9 }
  0xda   :  { %v141_v15 = vmul.f32 0.5, %v137_v12  ;;  %v446_v12 = vpop.permute.xlu1 %445 }
  0xdb   :  { %v140_v16 = vmul.f32 0.5, %v132_v14 }
  0xdc   :  { %676 = vtanh.f32 %v141_v15 }
  0xdd   :  { %678 = vtanh.f32 %v140_v16 }
  0xde   :  { %v470_v25 = vpop.permute.xlu1 %469 }
  0xe6   :  { %v677_v17 = vpop.eup %676 }
  0xe7   :  { %v679_v18 = vpop.eup %678  ;;  %v145_v19 = vadd.f32 1.0, %v677_v17 }
  0xe8   :  { %v144_v20 = vadd.f32 1.0, %v679_v18 }
  0xe9   :  { %v147_v21 = vmul.f32 0.5, %v145_v19 }
  0xea   :  { %v146_v22 = vmul.f32 0.5, %v144_v20 }
  0xec   :  { %v650_v23 = vpack.c.bf16 %v147_v21, %v146_v22 }
  0xee   :  { %651 = vmatprep.subr.bf16.mxu1 %v650_v23 }
  0xef   :  { %653 = vmatpush3.bf16.msra.mxu1 %v650_v23 }
  0xf0   :  { %630 = vmatprep.subr.mxu1 %v697_v26 }
  0xf2   :  { %615 = vmatmul.mubr.msk.f32.vlgmr.msra.gmra.mrb[0].mxu1 %vm157_vm1, %v32_v24  ;;  %v40_v24 = vld [vmem:[%s833_s6 + $0x8] sm:$0x3] }
  0xf3   :  { %631 = vmatpush3.msk.msra.mxu1 %vm351_vm2, %v42_v27  ;;  %632 = vmatprep.mubr.msk.f32.mxu1 %vm698_vm4, %v697_v26 }
  0xf6   :  { %633 = vmatmul.mubr.msk.f32.vlgmr.msra.gmra.mrb[2].mxu1 %vm341_vm3, %v33_v28 }
  0xf7   :  { %635 = vmatprep.mubr.msk.f32.mxu1 %vm698_vm4, %v697_v26 }
  0xfa   :  { %636 = vmatmul.mubr.msk.f32.gmra.mrb[4].mxu1 %vm341_vm3, %v34_v29 }
  0xfb   :  { %638 = vmatprep.mubr.msk.f32.mxu1 %vm698_vm4, %v697_v26 }
  0xfe   :  { %639 = vmatmul.mubr.msk.f32.gmra.mrb[6].mxu1 %vm341_vm3, %v35_v30 }
 0x1c5   :  { %v616_v35 = vpop.f32.mrb[0].mxu1 }
 0x1c6   :  { %v236_v36 = vadd.f32 %v616_v35, %v155_v34  ;;  %v230_v37 = vpop.f32.mrb[1].mxu1 }
 0x1c7   :  { %v231_v38 = vadd.f32 %v230_v37, %v150_v33 }
 0x1c8   :  { %v240_v39 = vmul.f32 0.5, %v236_v36 }
 0x1c9   :  { %v239_v40 = vmul.f32 0.5, %v231_v38  ;;  %v421_v51 = vpop.f32.mrb[2].mxu1 }
 0x1ca   :  { %680 = vtanh.f32 %v240_v39  ;;  %v634_v52 = vpop.f32.mrb[3].mxu1 }
 0x1cb   :  { %682 = vtanh.f32 %v239_v40 }
 0x1cd   :  { %v426_v53 = vpop.f32.mrb[4].mxu1 }
 0x1ce   :  { %v637_v54 = vpop.f32.mrb[5].mxu1 }
 0x1d1   :  { %v431_v55 = vpop.f32.mrb[6].mxu1 }
 0x1d2   :  { %v640_v56 = vpop.f32.mrb[7].mxu1 }
 0x1d4   :  { %v681_v41 = vpop.eup %680 }
 0x1d5   :  { %v683_v42 = vpop.eup %682  ;;  %v244_v43 = vadd.f32 1.0, %v681_v41 }
 0x1d6   :  { %v243_v44 = vadd.f32 1.0, %v683_v42 }
 0x1d7   :  { %v246_v45 = vmul.f32 0.5, %v244_v43 }
 0x1d8   :  { %v245_v46 = vmul.f32 0.5, %v243_v44 }
 0x1da   :  { %v655_v47 = vpack.c.bf16 %v246_v45, %v245_v46 }
 0x1dc   :  { %657 = vmatpush3.bf16.msk.msra.mxu0 %vm656_vm7, %v655_v47 }
 0x1df   :  { %622 = vmatmul.mubr.msk.f32.vlgmr.msra.gmra.mrb[2].mxu0 %vm247_vm8, %v36_v48 }
 0x1e0   :  { %624 = vmatprep.mubr.msk.f32.mxu0 %vm698_vm4, %v697_v26 }
 0x1e3   :  { %625 = vmatmul.mubr.msk.f32.gmra.mrb[4].mxu0 %vm247_vm8, %v37_v49 }
 0x1e4   :  { %627 = vmatprep.mubr.msk.f32.mxu0 %vm698_vm4, %v697_v26  ;;  %v465_v26 = vpop.permute.xlu0 %464 }
 0x1e7   :  { %628 = vmatmul.mubr.msk.f32.gmra.mrb[6].mxu0 %vm247_vm8, %v38_v50 }
 0x1e8   :  { %647 = vmatprep.mubr.msk.f32.mxu0 %vm472_vm9, %v39_v57 }
 0x2b2   :  { %v327_v60 = vpop.f32.mrb[2].mxu0 }
 0x2b3   :  { %v422_v62 = vadd.f32 %v421_v51, %v327_v60  ;;  %v623_v63 = vpop.f32.mrb[3].mxu0 }
 0x2b5   :  { %v448_v0 = vadd.f32 %v437_v61, %v422_v62 }
 0x2b6   :  { %v332_v2 = vpop.f32.mrb[4].mxu0 }
 0x2b7   :  { %v451_v3 = vmul.f32 0.5, %v448_v0  ;;  %v427_v5 = vadd.f32 %v426_v53, %v332_v2  ;;  %v626_v6 = vpop.f32.mrb[5].mxu0 }
 0x2b9   :  { %684 = vtanh.f32 %v451_v3  ;;  %v449_v7 = vadd.f32 %v441_v1, %v427_v5 }
 0x2ba   :  { %v337_v8 = vpop.f32.mrb[6].mxu0 }
 0x2bb   :  { %v452_v9 = vmul.f32 0.5, %v449_v7  ;;  %v432_v10 = vadd.f32 %v431_v55, %v337_v8  ;;  %v629_v11 = vpop.f32.mrb[7].mxu0 }
 0x2bd   :  { %686 = vtanh.f32 %v452_v9  ;;  %v450_v13 = vadd.f32 %v446_v12, %v432_v10 }
 0x2bf   :  { %v453_v4 = vmul.f32 0.5, %v450_v13 }
 0x2c1   :  { %688 = vtanh.f32 %v453_v4 }
 0x2c3   :  { %v685_v14 = vpop.eup %684 }
 0x2c4   :  { %v457_v15 = vadd.f32 1.0, %v685_v14 }
 0x2c6   :  { %v460_v18 = vmul.f32 0.5, %v457_v15 }
 0x2c7   :  { %v687_v16 = vpop.eup %686 }
 0x2c8   :  { %v458_v17 = vadd.f32 1.0, %v687_v16 }
 0x2ca   :  { %v461_v19 = vmul.f32 0.5, %v458_v17 }
 0x2cb   :  { %v689_v20 = vpop.eup %688 }
 0x2cc   :  { %v658_v21 = vpack.c.bf16 %v461_v19, %v460_v18  ;;  %v459_v22 = vadd.f32 1.0, %v689_v20 }
 0x2ce   :  { %659 = vmatprep.subr.bf16.mxu0 %v658_v21  ;;  %v462_v23 = vmul.f32 0.5, %v459_v22 }
 0x2cf   :  { %661 = vmatpush3.bf16.msra.mxu0 %v658_v21 }
 0x2d0   :  { %645 = vmatprep.subr.mxu0 %v462_v23 }
 0x2d3   :  { %646 = vmatpush3.msra.mxu0 %v462_v23 }
 0x2d4   :  { %648 = vmatmul.mubr.msk.f32.vlgmr.msra.gmra.mrb[8].mxu0 %vm472_vm9, %v40_v24 }
 0x3a7   :  { %v649_v27 = vpop.f32.mrb[8].mxu0 }
 0x3a8   :  { %v551_v28 = vadd.f32 %v649_v27, %v470_v25  ;;  %v545_v29 = vpop.f32.mrb[9].mxu0 }
 0x3a9   :  { %v546_v30 = vadd.f32 %v545_v29, %v465_v26 }
 0x3aa   :  { %v555_v31 = vmul.f32 0.5, %v551_v28 }
 0x3ab   :  { %v554_v32 = vmul.f32 0.5, %v546_v30 }
 0x3ac   :  { %690 = vtanh.f32 %v555_v31 }
 0x3ad   :  { %692 = vtanh.f32 %v554_v32 }
 0x3b6   :  { %v691_v33 = vpop.eup %690 }
 0x3b7   :  { %v693_v34 = vpop.eup %692  ;;  %v559_v35 = vadd.f32 1.0, %v691_v33 }
 0x3b8   :  { %v558_v36 = vadd.f32 1.0, %v693_v34 }
 0x3b9   :  { %v561_v37 = vmul.f32 0.5, %v559_v35 }
 0x3ba   :  { %v560_v38 = vmul.f32 0.5, %v558_v36 }
 0x3bb   :  { %565 = vst.msk [vmem:[%s834_s8 + $0x8] sm:$0x3] %vm564_vm10, %v561_v37 }
 0x3bc   :  { %563 = vst.msk [vmem:[%s834_s8] sm:$0xff] %vm562_vm11, %v560_v38 }

</bundles_post_ra>
